<compile_context>
chip_gen: v6e
topology: v6e:2x2x1
jax: 0.10.0
libtpu: 0.0.40
codegen_flags: <defaults>
</compile_context>

<pallas_src>
import jax
import jax.numpy as jnp
import numpy as np
from jax import lax
from jax.experimental import pallas as pl
from jax.experimental.pallas import tpu as pltpu


def _attn_all_heads_kernel(q_ref, kc_ref, kn_ref, vc_ref, vn_ref, o_ref):
    # q/k_new/v_new: (nh, 32, dh); k_cache/v_cache: (nh, s, dh); o: (32, nh*dh)
    q = q_ref[...]
    kc = kc_ref[...]
    kn = kn_ref[...]
    vc = vc_ref[...]
    vn = vn_ref[...]
    nh = q.shape[0]

    # Batched scores over heads, contracting dh of both operands
    # (no K transpose, no (s+32) concatenation materialized).
    dn_qk = (((2,), (2,)), ((0,), (0,)))
    sc = lax.dot_general(q, kc, dn_qk, preferred_element_type=jnp.float32)  # (nh,32,s)
    sn = lax.dot_general(q, kn, dn_qk, preferred_element_type=jnp.float32)  # (nh,32,32)

    # Joint softmax over the two chunks (matches torch: no 1/sqrt(dh) scale).
    m = jnp.maximum(jnp.max(sc, axis=-1, keepdims=True),
                    jnp.max(sn, axis=-1, keepdims=True))                    # (nh,32,1)
    ec = jnp.exp(sc - m)
    en = jnp.exp(sn - m)
    denom = (jnp.sum(ec, axis=-1, keepdims=True) +
             jnp.sum(en, axis=-1, keepdims=True))
    inv = pl.reciprocal(denom, approx=True)                                 # EUP slot

    # Split PV matmul:  probs[:, :, :s] @ v_cache + probs[:, :, s:] @ v_new.
    dn_pv = (((2,), (1,)), ((0,), (0,)))
    oc = lax.dot_general(ec.astype(vc.dtype), vc, dn_pv,
                         preferred_element_type=jnp.float32)
    on = lax.dot_general(en.astype(vn.dtype), vn, dn_pv,
                         preferred_element_type=jnp.float32)
    out = (oc + on) * inv                                                   # (nh,32,dh)

    # Lane-dense store: pack heads along the lane axis into one (32, nh*dh) slab.
    o_ref[...] = jnp.concatenate([out[h] for h in range(nh)],
                                 axis=-1).astype(o_ref.dtype)


def attention_loopback(q, k_cache, k_new, v_cache, v_new, nh):
    _, s, d = k_cache.shape
    dh = d // nh

    def to_heads(x):  # (1, L, d) -> (nh, L, dh)   (glue; needed because dh < 128)
        L = x.shape[1]
        return jnp.transpose(x.reshape(L, nh, dh), (1, 0, 2))

    qh, kch, knh, vch, vnh = (to_heads(t) for t in (q, k_cache, k_new, v_cache, v_new))

    # NOTE: for very long caches (s*dh blocks approaching VMEM, esp. v7x's
    # 64 MiB) add a cache-tile grid axis with an online (flash-style) softmax;
    # at these decode-style shapes a single resident block is fastest.
    out_slab = pl.pallas_call(
        _attn_all_heads_kernel,
        out_shape=jax.ShapeDtypeStruct((32, d), q.dtype),
        grid_spec=pltpu.PrefetchScalarGridSpec(
            num_scalar_prefetch=0,
            grid=(1,),
            in_specs=[
                pl.BlockSpec((nh, 32, dh), lambda i: (0, 0, 0)),  # q
                pl.BlockSpec((nh, s, dh), lambda i: (0, 0, 0)),   # k_cache
                pl.BlockSpec((nh, 32, dh), lambda i: (0, 0, 0)),  # k_new
                pl.BlockSpec((nh, s, dh), lambda i: (0, 0, 0)),   # v_cache
                pl.BlockSpec((nh, 32, dh), lambda i: (0, 0, 0)),  # v_new
            ],
            out_specs=pl.BlockSpec((32, d), lambda i: (0, 0)),
        ),
        compiler_params=pltpu.CompilerParams(
            dimension_semantics=("arbitrary",),
            vmem_limit_bytes=32 * 1024 * 1024,
        ),
    )(qh, kch, knh, vch, vnh)

    # (32, d) slab with heads on lanes -> (1, nh, 32, dh) as the module returns.
    out = jnp.transpose(out_slab.reshape(32, nh, dh), (1, 0, 2))[None]

    # k_ret / v_ret == last 32 rows of the concatenated cache permuted back,
    # which is exactly k_new / v_new — return them directly.
    return out, k_new, v_new


def _reference(q, k_cache, k_new, v_cache, v_new, nh):
    """Pure-JAX mirror of the PyTorch forward, for a correctness check."""
    _, s, d = k_cache.shape
    dh = d // nh
    rs = lambda x: jnp.transpose(x.reshape(1, x.shape[1], nh, dh), (0, 2, 1, 3))
    k = jnp.concatenate([rs(k_cache), rs(k_new)], axis=-2)
    v = jnp.concatenate([rs(v_cache), rs(v_new)], axis=-2)
    qh = rs(q)
    attn = jnp.einsum("bhqd,bhkd->bhqk", qh, k)
    probs = jax.nn.softmax(attn, axis=-1)
    out = jnp.einsum("bhqk,bhkd->bhqd", probs, v)
    k_ret = jnp.transpose(k[:, :, -32:, :], (0, 2, 1, 3)).reshape(1, 32, d)
    v_ret = jnp.transpose(v[:, :, -32:, :], (0, 2, 1, 3)).reshape(1, 32, d)
    return out, k_ret, v_ret


if __name__ == "__main__":
    # Shapes consistent with the module: q/k_new/v_new are (1, 32, d),
    # cache is (1, s, d).  Pick d=32, nh=4 (dh=8), s=16.
    nh, d, s = 4, 32, 16
    key = jax.random.PRNGKey(0)
    kq, kkc, kkn, kvc, kvn = jax.random.split(key, 5)
    q = jax.random.normal(kq, (1, 32, d), dtype=jnp.float32)
    k_cache = jax.random.normal(kkc, (1, s, d), dtype=jnp.float32)
    k_new = jax.random.normal(kkn, (1, 32, d), dtype=jnp.float32)
    v_cache = jax.random.normal(kvc, (1, s, d), dtype=jnp.float32)
    v_new = jax.random.normal(kvn, (1, 32, d), dtype=jnp.float32)

    out, k_ret, v_ret = attention_loopback(q, k_cache, k_new, v_cache, v_new, nh)
    jax.block_until_ready((out, k_ret, v_ret))

    ref_out, ref_k, ref_v = _reference(q, k_cache, k_new, v_cache, v_new, nh)
    # Tolerance accommodates the EUP approximate reciprocal in the softmax.
    np.testing.assert_allclose(np.asarray(out), np.asarray(ref_out), rtol=5e-3, atol=5e-3)
    np.testing.assert_allclose(np.asarray(k_ret), np.asarray(ref_k), rtol=0, atol=0)
    np.testing.assert_allclose(np.asarray(v_ret), np.asarray(ref_v), rtol=0, atol=0)

    print("KERNEL_OK")
</pallas_src>

<mosaic_0001>
module attributes {stable_mosaic.version = 11 : i64} {
  func.func @_attn_all_heads_kernel(%arg0: i32, %arg1: memref<4x32x8xf32, #tpu.memory_space<vmem>>, %arg2: memref<4x16x8xf32, #tpu.memory_space<vmem>>, %arg3: memref<4x32x8xf32, #tpu.memory_space<vmem>>, %arg4: memref<4x16x8xf32, #tpu.memory_space<vmem>>, %arg5: memref<4x32x8xf32, #tpu.memory_space<vmem>>, %arg6: memref<32x32xf32, #tpu.memory_space<vmem>>) attributes {dimension_semantics = [#tpu.dimension_semantics<arbitrary>], iteration_bounds = array<i64: 1>, scalar_prefetch = 0 : i64, scratch_operands = 0 : i64, tpu.core_type = #tpu.core_type<tc>, window_params = [{pipeline_mode = #tpu.pipeline_mode<synchronous>, transform_indices = @transform_0, window_bounds = array<i64: 4, 32, 8>}, {pipeline_mode = #tpu.pipeline_mode<synchronous>, transform_indices = @transform_1, window_bounds = array<i64: 4, 16, 8>}, {pipeline_mode = #tpu.pipeline_mode<synchronous>, transform_indices = @transform_2, window_bounds = array<i64: 4, 32, 8>}, {pipeline_mode = #tpu.pipeline_mode<synchronous>, transform_indices = @transform_3, window_bounds = array<i64: 4, 16, 8>}, {pipeline_mode = #tpu.pipeline_mode<synchronous>, transform_indices = @transform_4, window_bounds = array<i64: 4, 32, 8>}, {pipeline_mode = #tpu.pipeline_mode<synchronous>, transform_indices = @transform_5, window_bounds = array<i64: 32, 32>}]} {
    %c0 = arith.constant 0 : index
    %c0_0 = arith.constant 0 : index
    %c0_1 = arith.constant 0 : index
    %0 = vector.load %arg1[%c0, %c0_0, %c0_1] : memref<4x32x8xf32, #tpu.memory_space<vmem>>, vector<4x32x8xf32>
    %c0_2 = arith.constant 0 : index
    %c0_3 = arith.constant 0 : index
    %c0_4 = arith.constant 0 : index
    %1 = vector.load %arg2[%c0_2, %c0_3, %c0_4] : memref<4x16x8xf32, #tpu.memory_space<vmem>>, vector<4x16x8xf32>
    %c0_5 = arith.constant 0 : index
    %c0_6 = arith.constant 0 : index
    %c0_7 = arith.constant 0 : index
    %2 = vector.load %arg3[%c0_5, %c0_6, %c0_7] : memref<4x32x8xf32, #tpu.memory_space<vmem>>, vector<4x32x8xf32>
    %c0_8 = arith.constant 0 : index
    %c0_9 = arith.constant 0 : index
    %c0_10 = arith.constant 0 : index
    %3 = vector.load %arg4[%c0_8, %c0_9, %c0_10] : memref<4x16x8xf32, #tpu.memory_space<vmem>>, vector<4x16x8xf32>
    %c0_11 = arith.constant 0 : index
    %c0_12 = arith.constant 0 : index
    %c0_13 = arith.constant 0 : index
    %4 = vector.load %arg5[%c0_11, %c0_12, %c0_13] : memref<4x32x8xf32, #tpu.memory_space<vmem>>, vector<4x32x8xf32>
    %cst = arith.constant dense<0.000000e+00> : vector<4x32x16xf32>
    %5 = tpu.matmul %0, %1, %cst {dimension_numbers = #tpu.dot_dimension_numbers<[2], [2], [1], [1], [0, 0, 0, 1, 1, 1], [0], [0]>} : vector<4x32x8xf32>, vector<4x16x8xf32>, vector<4x32x16xf32> -> vector<4x32x16xf32>
    %cst_14 = arith.constant dense<0.000000e+00> : vector<4x32x32xf32>
    %6 = tpu.matmul %0, %2, %cst_14 {dimension_numbers = #tpu.dot_dimension_numbers<[2], [2], [1], [1], [0, 0, 0, 1, 1, 1], [0], [0]>} : vector<4x32x8xf32>, vector<4x32x8xf32>, vector<4x32x32xf32> -> vector<4x32x32xf32>
    %cst_15 = arith.constant dense<0xFF800000> : vector<4x32xf32>
    %7 = vector.multi_reduction <maximumf>, %5, %cst_15 [2] : vector<4x32x16xf32> to vector<4x32xf32>
    %8 = vector.shape_cast %7 : vector<4x32xf32> to vector<4x32x1xf32>
    %cst_16 = arith.constant dense<0xFF800000> : vector<4x32xf32>
    %9 = vector.multi_reduction <maximumf>, %6, %cst_16 [2] : vector<4x32x32xf32> to vector<4x32xf32>
    %10 = vector.shape_cast %9 : vector<4x32xf32> to vector<4x32x1xf32>
    %11 = arith.maximumf %8, %10 : vector<4x32x1xf32>
    %12 = vector.broadcast %11 : vector<4x32x1xf32> to vector<4x32x16xf32>
    %13 = arith.subf %5, %12 : vector<4x32x16xf32>
    %14 = math.exp %13 : vector<4x32x16xf32>
    %15 = vector.broadcast %11 : vector<4x32x1xf32> to vector<4x32x32xf32>
    %16 = arith.subf %6, %15 : vector<4x32x32xf32>
    %17 = math.exp %16 : vector<4x32x32xf32>
    %cst_17 = arith.constant dense<0.000000e+00> : vector<4x32xf32>
    %18 = vector.multi_reduction <add>, %14, %cst_17 [2] : vector<4x32x16xf32> to vector<4x32xf32>
    %19 = vector.shape_cast %18 : vector<4x32xf32> to vector<4x32x1xf32>
    %cst_18 = arith.constant dense<0.000000e+00> : vector<4x32xf32>
    %20 = vector.multi_reduction <add>, %17, %cst_18 [2] : vector<4x32x32xf32> to vector<4x32xf32>
    %21 = vector.shape_cast %20 : vector<4x32xf32> to vector<4x32x1xf32>
    %22 = arith.addf %19, %21 : vector<4x32x1xf32>
    %23 = tpu.reciprocal %22 {approx = true} : vector<4x32x1xf32> -> vector<4x32x1xf32>
    %cst_19 = arith.constant dense<0.000000e+00> : vector<4x32x8xf32>
    %24 = tpu.matmul %14, %3, %cst_19 {dimension_numbers = #tpu.dot_dimension_numbers<[2], [1], [1], [2], [0, 0, 0, 1, 1, 2], [0], [0]>} : vector<4x32x16xf32>, vector<4x16x8xf32>, vector<4x32x8xf32> -> vector<4x32x8xf32>
    %cst_20 = arith.constant dense<0.000000e+00> : vector<4x32x8xf32>
    %25 = tpu.matmul %17, %4, %cst_20 {dimension_numbers = #tpu.dot_dimension_numbers<[2], [1], [1], [2], [0, 0, 0, 1, 1, 2], [0], [0]>} : vector<4x32x32xf32>, vector<4x32x8xf32>, vector<4x32x8xf32> -> vector<4x32x8xf32>
    %26 = arith.addf %24, %25 : vector<4x32x8xf32>
    %27 = vector.broadcast %23 : vector<4x32x1xf32> to vector<4x32x8xf32>
    %28 = arith.mulf %26, %27 : vector<4x32x8xf32>
    %29 = vector.extract_strided_slice %28 {offsets = [0, 0, 0], sizes = [1, 32, 8], strides = [1, 1, 1]} : vector<4x32x8xf32> to vector<1x32x8xf32>
    %30 = vector.shape_cast %29 : vector<1x32x8xf32> to vector<32x8xf32>
    %31 = vector.extract_strided_slice %28 {offsets = [1, 0, 0], sizes = [1, 32, 8], strides = [1, 1, 1]} : vector<4x32x8xf32> to vector<1x32x8xf32>
    %32 = vector.shape_cast %31 : vector<1x32x8xf32> to vector<32x8xf32>
    %33 = vector.extract_strided_slice %28 {offsets = [2, 0, 0], sizes = [1, 32, 8], strides = [1, 1, 1]} : vector<4x32x8xf32> to vector<1x32x8xf32>
    %34 = vector.shape_cast %33 : vector<1x32x8xf32> to vector<32x8xf32>
    %35 = vector.extract_strided_slice %28 {offsets = [3, 0, 0], sizes = [1, 32, 8], strides = [1, 1, 1]} : vector<4x32x8xf32> to vector<1x32x8xf32>
    %36 = vector.shape_cast %35 : vector<1x32x8xf32> to vector<32x8xf32>
    %37 = tpu.concatenate %30, %32, %34, %36 in 1 : vector<32x8xf32>, vector<32x8xf32>, vector<32x8xf32>, vector<32x8xf32> -> vector<32x32xf32>
    %c0_21 = arith.constant 0 : index
    %c0_22 = arith.constant 0 : index
    %38 = vector.load %arg6[%c0_21, %c0_22] : memref<32x32xf32, #tpu.memory_space<vmem>>, vector<32x32xf32>
    tpu.vector_store %arg6[%c0_21, %c0_22], %37 {strides = array<i32>} : memref<32x32xf32, #tpu.memory_space<vmem>>, vector<32x32xf32>,
    return
  }
  func.func @transform_0(%arg0: i32) -> (i32, i32, i32) {
    %c0_i32 = arith.constant 0 : i32
    %c0_i32_0 = arith.constant 0 : i32
    %c0_i32_1 = arith.constant 0 : i32
    %c0_i32_2 = arith.constant 0 : i32
    return %c0_i32, %c0_i32_0, %c0_i32_1 : i32, i32, i32
  }
  func.func @transform_1(%arg0: i32) -> (i32, i32, i32) {
    %c0_i32 = arith.constant 0 : i32
    %c0_i32_0 = arith.constant 0 : i32
    %c0_i32_1 = arith.constant 0 : i32
    %c0_i32_2 = arith.constant 0 : i32
    return %c0_i32, %c0_i32_0, %c0_i32_1 : i32, i32, i32
  }
  func.func @transform_2(%arg0: i32) -> (i32, i32, i32) {
    %c0_i32 = arith.constant 0 : i32
    %c0_i32_0 = arith.constant 0 : i32
    %c0_i32_1 = arith.constant 0 : i32
    %c0_i32_2 = arith.constant 0 : i32
    return %c0_i32, %c0_i32_0, %c0_i32_1 : i32, i32, i32
  }
  func.func @transform_3(%arg0: i32) -> (i32, i32, i32) {
    %c0_i32 = arith.constant 0 : i32
    %c0_i32_0 = arith.constant 0 : i32
    %c0_i32_1 = arith.constant 0 : i32
    %c0_i32_2 = arith.constant 0 : i32
    return %c0_i32, %c0_i32_0, %c0_i32_1 : i32, i32, i32
  }
  func.func @transform_4(%arg0: i32) -> (i32, i32, i32) {
    %c0_i32 = arith.constant 0 : i32
    %c0_i32_0 = arith.constant 0 : i32
    %c0_i32_1 = arith.constant 0 : i32
    %c0_i32_2 = arith.constant 0 : i32
    return %c0_i32, %c0_i32_0, %c0_i32_1 : i32, i32, i32
  }
  func.func @transform_5(%arg0: i32) -> (i32, i32) {
    %c0_i32 = arith.constant 0 : i32
    %c0_i32_0 = arith.constant 0 : i32
    %c0_i32_1 = arith.constant 0 : i32
    return %c0_i32, %c0_i32_0 : i32, i32
  }
}

</mosaic_0001>

<bundles_post_ra>
// kernel: tpu_custom_call.1
= control target key start
LH: loop header
LB: loop body
LE: loop exit
PB: predicated region body
PF: predicated region fallthrough
CT: control target
= control target key end

     0   :  { %vm85_vm0 = vcmask 64512   ;;  %s3363_s0 = inlined_call_operand.vmem [shape: f32[4,32,8], index: 0, kind: input, shape index: {}]   ;;  %s3364_s1 = inlined_call_operand.vmem [shape: f32[4,16,8], index: 1, kind: input, shape index: {}]   ;;  %s3365_s2 = inlined_call_operand.vmem [shape: f32[4,32,8], index: 2, kind: input, shape index: {}]   ;;  %s3366_s3 = inlined_call_operand.vmem [shape: f32[4,16,8], index: 3, kind: input, shape index: {}]   ;;  %s3367_s4 = inlined_call_operand.vmem [shape: f32[4,32,8], index: 4, kind: input, shape index: {}]   ;;  %s3368_s5 = inlined_call_operand.hbm [shape: f32[32,32], index: 5, kind: output, shape index: {}]  }
   0x1   :  { %v38_v0 = vld [vmem:[%s3364_s1 + $0x8] sm:$0xff]  ;;  %v40_v1 = vld [vmem:[%s3364_s1 + $0x18] sm:$0xff]  ;;  %v37_v2 = vld [vmem:[%s3364_s1] sm:$0xff] }
   0x2   :  { %2297 = vmatprep.subr.msk.mxu0 %vm85_vm0, %v38_v0  ;;  %2307 = vmatprep.subr.msk.mxu1 %vm85_vm0, %v40_v1  ;;  %v39_v3 = vld [vmem:[%s3364_s1 + $0x10] sm:$0xff]  ;;  %v2664_v4 = vld [vmem:[%s3363_s0] sm:$0xff]  ;;  %v44_v6 = vld [vmem:[%s3364_s1 + $0x38] sm:$0xff] }
   0x3   :  { %v25_v5 = vld [vmem:[%s3363_s0 + $0x20] sm:$0xff]  ;;  %2298 = vmatpush3.xpose.msk.msra.mxu0 %vm85_vm0, %v38_v0  ;;  %2308 = vmatpush3.xpose.msk.msra.mxu1 %vm85_vm0, %v40_v1  ;;  %v42_v7 = vld [vmem:[%s3364_s1 + $0x28] sm:$0xff]  ;;  %v2698_v10 = vld [vmem:[%s3363_s0 + $0x30] sm:$0xff] }
   0x4   :  { %2299 = vmatprep.subr.msk.mxu0 %vm85_vm0, %v37_v2  ;;  %2309 = vmatprep.subr.msk.mxu1 %vm85_vm0, %v39_v3  ;;  %v2687_v8 = vld [vmem:[%s3363_s0 + $0x8] sm:$0xff]  ;;  %v43_v11 = vld [vmem:[%s3364_s1 + $0x30] sm:$0xff]  ;;  %v41_v13 = vld [vmem:[%s3364_s1 + $0x20] sm:$0xff] }
   0x5   :  { %2301 = vmatprep.mubr.msk.f32.mxu0 %vm85_vm0, %v2664_v4  ;;  %2311 = vmatprep.mubr.msk.f32.mxu1 %vm85_vm0, %v25_v5  ;;  %v2692_v9 = vld [vmem:[%s3363_s0 + $0x28] sm:$0xff]  ;;  %v2711_v12 = vld [vmem:[%s3363_s0 + $0x10] sm:$0xff]  ;;  %v2722_v14 = vld [vmem:[%s3363_s0 + $0x38] sm:$0xff] }
   0x6   :  { %v2727_v15 = vld [vmem:[%s3363_s0 + $0x18] sm:$0xff]  ;;  %v2734_v16 = vld [vmem:[%s3363_s0 + $0x60] sm:$0xff] }
   0x7   :  { %2300 = vmatpush3.xpose.msk.msra.mxu0 %vm85_vm0, %v37_v2  ;;  %2310 = vmatpush3.xpose.msk.msra.mxu1 %vm85_vm0, %v39_v3  ;;  %v52_v17 = vld [vmem:[%s3365_s2 + $0x38] sm:$0xff]  ;;  %v2749_v18 = vld [vmem:[%s3363_s0 + $0x40] sm:$0xff] }
   0x8   :  { %2327 = vmatprep.subr.msk.mxu1 %vm85_vm0, %v44_v6  ;;  %2317 = vmatprep.subr.msk.mxu0 %vm85_vm0, %v42_v7  ;;  %v48_v19 = vld [vmem:[%s3365_s2 + $0x18] sm:$0xff] }
   0xa   :  { %2302 = vmatmul.mubr.msk.f32.vlgmr.msra.gmra.mxu0 %vm85_vm0, %v2687_v8  ;;  %2312 = vmatmul.mubr.msk.f32.vlgmr.msra.gmra.mxu1 %vm85_vm0, %v2692_v9 }
   0xb   :  { %2328 = vmatpush3.xpose.msk.msra.mxu1 %vm85_vm0, %v44_v6  ;;  %2314 = vmatprep.mubr.msk.f32.mxu1 %vm85_vm0, %v2698_v10 }
   0xc   :  { %2329 = vmatprep.subr.msk.mxu1 %vm85_vm0, %v43_v11  ;;  %2318 = vmatpush3.xpose.msk.msra.mxu0 %vm85_vm0, %v42_v7 }
   0xd   :  { %2304 = vmatprep.mubr.msk.f32.mxu0 %vm85_vm0, %v2711_v12  ;;  %2319 = vmatprep.subr.msk.mxu0 %vm85_vm0, %v41_v13 }
   0xe   :  { %2315 = vmatmul.mubr.msk.f32.gmra.mxu1 %vm85_vm0, %v2722_v14  ;;  %2305 = vmatmul.mubr.msk.f32.gmra.mxu0 %vm85_vm0, %v2727_v15 }
   0xf   :  { %10 = vsyncpa [#allocation3], 0  ;;  %2330 = vmatpush3.xpose.msk.msra.mxu1 %vm85_vm0, %v43_v11  ;;  %2331 = vmatprep.mubr.msk.f32.mxu1 %vm85_vm0, %v2734_v16  ;;  %v2760_v20 = vld [vmem:[%s3363_s0 + $0x68] sm:$0xff]  ;;  %v51_v22 = vld [vmem:[%s3365_s2 + $0x30] sm:$0xff]  ;;  %vm886_vm1 = vcmask 130048   ;;  %vm935_vm2 = vcmask 261120  }
  0x10   :  { %2351 = vmatprep.subr.msk.mxu1 %vm85_vm0, %v52_v17  ;;  %2320 = vmatpush3.xpose.msk.msra.mxu0 %vm85_vm0, %v41_v13  ;;  %v2767_v21 = vld [vmem:[%s3363_s0 + $0x48] sm:$0xff]  ;;  %v2780_v23 = vld [vmem:[%s3363_s0 + $0x70] sm:$0xff]  ;;  %v36_v25 = vld [vmem:[%s3363_s0 + $0x78] sm:$0xff]  ;;  %s2613_s11 = smov 16   ;;  %s2614_s12 = smov 24   ;;  %vm2072_vm3 = vcmask 195584  }
  0x11   :  { %2321 = vmatprep.mubr.msk.f32.mxu0 %vm85_vm0, %v2749_v18  ;;  %2337 = vmatprep.subr.msk.mxu0 %vm85_vm0, %v48_v19  ;;  %v47_v24 = vld [vmem:[%s3365_s2 + $0x10] sm:$0xff]  ;;  %v50_v27 = vld [vmem:[%s3365_s2 + $0x28] sm:$0xff]  ;;  %v32_v29 = vld [vmem:[%s3363_s0 + $0x58] sm:$0xff]  ;;  %s2615_s13 = smov [#allocation2]  }
  0x12   :  { %2332 = vmatmul.mubr.msk.f32.vlgmr.msra.gmra.mxu1 %vm85_vm0, %v2760_v20  ;;  %v31_v26 = vld [vmem:[%s3363_s0 + $0x50] sm:$0xff]  ;;  %v46_v28 = vld [vmem:[%s3365_s2 + $0x8] sm:$0xff]  ;;  %v49_v30 = vld [vmem:[%s3365_s2 + $0x20] sm:$0xff]  ;;  %s2086_s14 = sshll.u32 %s2615_s13, 4  ;;  %s2087_s14 = int_to_ptr.vmem [resolvable:$true] %s2086_s14 }
  0x13   :  { %2352 = vmatpush3.xpose.msk.msra.mxu1 %vm85_vm0, %v52_v17  ;;  %2322 = vmatmul.mubr.msk.f32.vlgmr.msra.gmra.mxu0 %vm85_vm0, %v2767_v21  ;;  %v45_v31 = vld [vmem:[%s3365_s2] sm:$0xff]  ;;  %v60_v32 = vld [vmem:[%s3365_s2 + $0x78] sm:$0xff]  ;;  %v59_v34 = vld [vmem:[%s3365_s2 + $0x70] sm:$0xff]  ;;  %s2590_s15 = scalar_lea.vmem %s2087_s14, 512  ;;  %p2595_p1 = scmp.lt.s32.totalorder %s2087_s14, %s2087_s14 }
  0x14   :  { %2353 = vmatprep.subr.msk.mxu1 %vm85_vm0, %v51_v22  ;;  %2338 = vmatpush3.xpose.msk.msra.mxu0 %vm85_vm0, %v48_v19  ;;  %v56_v33 = vld [vmem:[%s3365_s2 + $0x58] sm:$0xff]  ;;  %v55_v35 = vld [vmem:[%s3365_s2 + $0x50] sm:$0xff]  ;;  %v58_v36 = vld [vmem:[%s3365_s2 + $0x68] sm:$0xff]  ;;  %p2591_p0 = scmp.ne.s32.totalorder %s2087_s14, %s2590_s15  ;;  %p2596_p2 = scmp.lt.s32.totalorder %s2590_s15, %s2590_s15 }
  0x15   :  { %2334 = vmatprep.mubr.msk.f32.mxu1 %vm85_vm0, %v2780_v23  ;;  %2339 = vmatprep.subr.msk.mxu0 %vm85_vm0, %v47_v24  ;;  %v54_v37 = vld [vmem:[%s3365_s2 + $0x48] sm:$0xff]  ;;  %v57_v38 = vld [vmem:[%s3365_s2 + $0x60] sm:$0xff] }
  0x16   :  { %2335 = vmatmul.mubr.msk.f32.gmra.mxu1 %vm85_vm0, %v36_v25  ;;  %2324 = vmatprep.mubr.msk.f32.mxu0 %vm85_vm0, %v31_v26  ;;  %v53_v39 = vld [vmem:[%s3365_s2 + $0x40] sm:$0xff]  ;;  %p2597_p3 = por %p2596_p2, %p2595_p1 }
  0x17   :  { %2354 = vmatpush3.xpose.msk.msra.mxu1 %vm85_vm0, %v51_v22  ;;  %2359 = vmatprep.mubr.msk.f32.mxu1 %vm85_vm0, %v25_v5 }
  0x18   :  { %2355 = vmatprep.subr.msk.mxu1 %vm85_vm0, %v50_v27  ;;  %2340 = vmatpush3.xpose.msk.msra.mxu0 %vm85_vm0, %v47_v24  ;;  %p2598_p4 = pnand %p2597_p3, %p2591_p0 }
  0x19   :  { %2341 = vmatprep.subr.msk.mxu0 %vm85_vm0, %v46_v28  ;;  %2325 = vmatmul.mubr.msk.f32.gmra.mxu0 %vm85_vm0, %v32_v29 }
  0x1a   :  { %2345 = vmatprep.mubr.msk.f32.mxu0 %vm85_vm0, %v2664_v4 }
  0x1b   :  { %2356 = vmatpush3.xpose.msk.msra.mxu1 %vm85_vm0, %v50_v27 }
  0x1c   :  { %2357 = vmatprep.subr.msk.mxu1 %vm85_vm0, %v49_v30  ;;  %2342 = vmatpush3.xpose.msk.msra.mxu0 %vm85_vm0, %v46_v28 }
  0x1d   :  { %2343 = vmatprep.subr.msk.mxu0 %vm85_vm0, %v45_v31 }
  0x1f   :  { %2358 = vmatpush3.xpose.msk.msra.mxu1 %vm85_vm0, %v49_v30 }
  0x20   :  { %2344 = vmatpush3.xpose.msk.msra.mxu0 %vm85_vm0, %v45_v31  ;;  %2379 = vmatprep.subr.msk.mxu1 %vm85_vm0, %v60_v32 }
  0x21   :  { %2365 = vmatprep.subr.msk.mxu0 %vm85_vm0, %v56_v33 }
  0x22   :  { %2360 = vmatmul.mubr.msk.f32.vlgmr.msra.gmra.mxu1 %vm85_vm0, %v2692_v9 }
  0x23   :  { %2380 = vmatpush3.xpose.msk.msra.mxu1 %vm85_vm0, %v60_v32  ;;  %2346 = vmatmul.mubr.msk.f32.vlgmr.msra.gmra.mxu0 %vm85_vm0, %v2687_v8 }
  0x24   :  { %2362 = vmatprep.mubr.msk.f32.mxu1 %vm85_vm0, %v2698_v10  ;;  %2366 = vmatpush3.xpose.msk.msra.mxu0 %vm85_vm0, %v56_v33 }
  0x25   :  { %2381 = vmatprep.subr.msk.mxu1 %vm85_vm0, %v59_v34  ;;  %2348 = vmatprep.mubr.msk.f32.mxu0 %vm85_vm0, %v2711_v12 }
  0x26   :  { %2363 = vmatmul.mubr.msk.f32.gmra.mxu1 %vm85_vm0, %v2722_v14  ;;  %2367 = vmatprep.subr.msk.mxu0 %vm85_vm0, %v55_v35 }
  0x27   :  { %2382 = vmatpush3.xpose.msk.msra.mxu1 %vm85_vm0, %v59_v34  ;;  %2349 = vmatmul.mubr.msk.f32.gmra.mxu0 %vm85_vm0, %v2727_v15  ;;  %v76_v34 = vld [vmem:[%s3367_s4 + $0x38] sm:$0xff] }
  0x28   :  { %2368 = vmatpush3.xpose.msk.msra.mxu0 %vm85_vm0, %v55_v35  ;;  %2383 = vmatprep.subr.msk.mxu1 %vm85_vm0, %v58_v36 }
  0x29   :  { %2369 = vmatprep.subr.msk.mxu0 %vm85_vm0, %v54_v37  ;;  %2387 = vmatprep.mubr.msk.f32.mxu1 %vm85_vm0, %v2734_v16 }
  0x2a   :  { %2373 = vmatprep.mubr.msk.f32.mxu0 %vm85_vm0, %v2749_v18 }
  0x2b   :  { %2384 = vmatpush3.xpose.msk.msra.mxu1 %vm85_vm0, %v58_v36 }
  0x2c   :  { %2370 = vmatpush3.xpose.msk.msra.mxu0 %vm85_vm0, %v54_v37  ;;  %2385 = vmatprep.subr.msk.mxu1 %vm85_vm0, %v57_v38  ;;  %v75_v37 = vld [vmem:[%s3367_s4 + $0x30] sm:$0xff] }
  0x2d   :  { %2371 = vmatprep.subr.msk.mxu0 %vm85_vm0, %v53_v39 }
  0x2f   :  { %2386 = vmatpush3.xpose.msk.msra.mxu1 %vm85_vm0, %v57_v38 }
  0x30   :  { %2372 = vmatpush3.xpose.msk.msra.mxu0 %vm85_vm0, %v53_v39  ;;  %2407 = vmatprep.subr.mxu1 %v76_v34  ;;  %v74_v39 = vld [vmem:[%s3367_s4 + $0x28] sm:$0xff] }
  0x32   :  { %2388 = vmatmul.mubr.msk.f32.vlgmr.msra.gmra.mxu1 %vm85_vm0, %v2760_v20 }
  0x33   :  { %2374 = vmatmul.mubr.msk.f32.vlgmr.msra.gmra.mxu0 %vm85_vm0, %v2767_v21  ;;  %2390 = vmatprep.mubr.msk.f32.mxu1 %vm85_vm0, %v2780_v23 }
  0x34   :  { %2376 = vmatprep.mubr.msk.f32.mxu0 %vm85_vm0, %v31_v26  ;;  %2408 = vmatpush3.msra.mxu1 %v76_v34 }
  0x35   :  { %2409 = vmatprep.subr.mxu1 %v75_v37 }
  0x36   :  { %2391 = vmatmul.mubr.msk.f32.gmra.mxu1 %vm85_vm0, %v36_v25 }
  0x37   :  { %2377 = vmatmul.mubr.msk.f32.gmra.mxu0 %vm85_vm0, %v32_v29  ;;  %2410 = vmatpush3.msra.mxu1 %v75_v37 }
  0x38   :  { %2411 = vmatprep.subr.mxu1 %v74_v39 }
  0x39   :  { %2412 = vmatpush3.msra.mxu1 %v74_v39 }
  0xca   :  { %v2895_v40 = vpop.f32.mrf.mxu0  ;;  %v2897_v41 = vpop.f32.mrf.mxu1 }
  0xcb   :  { %v902_v42 = vsel %vm886_vm1, %v2897_v41, -inf  ;;  %v890_v43 = vsel %vm886_vm1, %v2895_v40, -inf }
  0xcc   :  { %903 = vmax.xlane.f32.xlu0 %v902_v42  ;;  %v2903_v44 = vpop.f32.mrf.mxu1  ;;  %891 = vmax.xlane.f32.xlu1 %v890_v43  ;;  %v2905_v45 = vpop.f32.mrf.mxu0 }
  0xcd   :  { %v887_v46 = vsel %vm886_vm1, %v2905_v45, -inf  ;;  %v899_v49 = vsel %vm886_vm1, %v2903_v44, -inf }
  0xce   :  { %v2909_v47 = vpop.f32.mrf.mxu1  ;;  %v2911_v48 = vpop.f32.mrf.mxu0 }
  0xcf   :  { %v896_v51 = vsel %vm886_vm1, %v2911_v48, -inf  ;;  %v908_v59 = vsel %vm886_vm1, %v2909_v47, -inf }
  0xd0   :  { %v2915_v50 = vpop.f32.mrf.mxu1  ;;  %900 = vmax.xlane.f32.xlu1 %v899_v49  ;;  %888 = vmax.xlane.f32.xlu0 %v887_v46  ;;  %v2919_v52 = vpop.f32.mrf.mxu0  ;;  %v73_v46 = vld [vmem:[%s3367_s4 + $0x20] sm:$0xff] }
  0xd1   :  { %v905_v54 = vsel %vm886_vm1, %v2915_v50, -inf  ;;  %v893_v63 = vsel %vm886_vm1, %v2919_v52, -inf  ;;  %2413 = vmatprep.subr.mxu1 %v73_v46 }
  0xd2   :  { %v2921_v53 = vpop.f32.mrf.mxu1  ;;  %2414 = vmatpush3.msra.mxu1 %v73_v46 }
  0xd3   :  { %v2927_v56 = vpop.f32.mrf.mxu0  ;;  %v926_v5 = vsel %vm886_vm1, %v2921_v53, -inf }
  0xd4   :  { %v2925_v55 = vpop.f32.mrf.mxu1  ;;  %906 = vmax.xlane.f32.xlu1 %v905_v54  ;;  %897 = vmax.xlane.f32.xlu0 %v896_v51  ;;  %v914_v1 = vsel %vm886_vm1, %v2927_v56, -inf  ;;  %v72_v51 = vld [vmem:[%s3367_s4 + $0x18] sm:$0xff]  ;;  %v71_v54 = vld [vmem:[%s3367_s4 + $0x10] sm:$0xff] }
  0xd5   :  { %v923_v58 = vsel %vm886_vm1, %v2925_v55, -inf  ;;  %v2937_v61 = vpop.f32.mrf.mxu0  ;;  %2393 = vmatprep.subr.mxu0 %v72_v51 }
  0xd6   :  { %v2929_v57 = vpop.f32.mrf.mxu1  ;;  %v911_v10 = vsel %vm886_vm1, %v2937_v61, -inf  ;;  %2394 = vmatpush3.msra.mxu0 %v72_v51 }
  0xd7   :  { %v932_v42 = vsel %vm886_vm1, %v2929_v57, -inf  ;;  %2395 = vmatprep.subr.mxu0 %v71_v54 }
  0xd8   :  { %924 = vmax.xlane.f32.xlu1 %v923_v58  ;;  %909 = vmax.xlane.f32.xlu0 %v908_v59  ;;  %v2935_v60 = vpop.f32.mrf.mxu1  ;;  %v70_v58 = vld [vmem:[%s3367_s4 + $0x8] sm:$0xff]  ;;  %v69_v59 = vld [vmem:[%s3367_s4] sm:$0xff] }
  0xd9   :  { %v929_v62 = vsel %vm886_vm1, %v2935_v60, -inf  ;;  %v2943_v0 = vpop.f32.mrf.mxu0  ;;  %2396 = vmatpush3.msra.mxu0 %v71_v54 }
  0xda   :  { %v920_v14 = vsel %vm886_vm1, %v2943_v0, -inf  ;;  %2397 = vmatprep.subr.mxu0 %v70_v58 }
  0xdb   :  { %v2947_v2 = vpop.f32.mrf.mxu0  ;;  %2398 = vmatpush3.msra.mxu0 %v70_v58 }
  0xdc   :  { %894 = vmax.xlane.f32.xlu0 %v893_v63  ;;  %930 = vmax.xlane.f32.xlu1 %v929_v62  ;;  %v917_v16 = vsel %vm886_vm1, %v2947_v2, -inf  ;;  %v3050_v62 = vld [vmem:[%s3367_s4 + $0x58] sm:$0xff] }
  0xdd   :  { %2399 = vmatprep.subr.mxu0 %v69_v59  ;;  %v3055_v63 = vld [vmem:[%s3367_s4 + $0x78] sm:$0xff] }
  0xde   :  { %2400 = vmatpush3.msra.mxu0 %v69_v59  ;;  %2435 = vmatprep.subr.mxu1 %v3055_v63 }
  0xdf   :  { %2421 = vmatprep.subr.mxu0 %v3050_v62 }
  0xe0   :  { %915 = vmax.xlane.f32.xlu0 %v914_v1 }
  0xe2   :  { %v2949_v3 = vpop.f32.mrf.mxu1 }
  0xe3   :  { %v951_v4 = vsel %vm935_vm2, %v2949_v3, -inf  ;;  %v2955_v6 = vpop.f32.mrf.mxu0 }
  0xe4   :  { %v2957_v7 = vpop.f32.mrf.mxu1  ;;  %952 = vmax.xlane.f32.xlu1 %v951_v4  ;;  %927 = vmax.xlane.f32.xlu0 %v926_v5  ;;  %v939_v19 = vsel %vm935_vm2, %v2955_v6, -inf }
  0xe5   :  { %v2959_v8 = vpop.f32.mrf.mxu0  ;;  %v948_v9 = vsel %vm935_vm2, %v2957_v7, -inf }
  0xe6   :  { %v2965_v11 = vpop.f32.mrf.mxu1  ;;  %v936_v24 = vsel %vm935_vm2, %v2959_v8, -inf }
  0xe7   :  { %v2967_v12 = vpop.f32.mrf.mxu0  ;;  %v957_v13 = vsel %vm935_vm2, %v2965_v11, -inf }
  0xe8   :  { %949 = vmax.xlane.f32.xlu1 %v948_v9  ;;  %912 = vmax.xlane.f32.xlu0 %v911_v10  ;;  %v2979_v18 = vpop.f32.mrf.mxu1  ;;  %v945_v26 = vsel %vm935_vm2, %v2967_v12, -inf }
  0xe9   :  { %v2973_v15 = vpop.f32.mrf.mxu0  ;;  %v954_v20 = vsel %vm935_vm2, %v2979_v18, -inf }
  0xea   :  { %v942_v17 = vsel %vm935_vm2, %v2973_v15, -inf }
  0xec   :  { %958 = vmax.xlane.f32.xlu1 %v957_v13  ;;  %921 = vmax.xlane.f32.xlu0 %v920_v14 }
  0xf0   :  { %918 = vmax.xlane.f32.xlu0 %v917_v16  ;;  %943 = vmax.xlane.f32.xlu1 %v942_v17 }
  0xf2   :  { %v2985_v21 = vpop.f32.mrf.mxu1 }
  0xf3   :  { %v2987_v22 = vpop.f32.mrf.mxu0  ;;  %v975_v23 = vsel %vm935_vm2, %v2985_v21, -inf }
  0xf4   :  { %940 = vmax.xlane.f32.xlu0 %v939_v19  ;;  %955 = vmax.xlane.f32.xlu1 %v954_v20  ;;  %v2999_v28 = vpop.f32.mrf.mxu1  ;;  %v963_v30 = vsel %vm935_vm2, %v2987_v22, -inf }
  0xf5   :  { %v2993_v25 = vpop.f32.mrf.mxu0  ;;  %v972_v31 = vsel %vm935_vm2, %v2999_v28, -inf }
  0xf6   :  { %v960_v27 = vsel %vm935_vm2, %v2993_v25, -inf  ;;  %v3009_v33 = vpop.f32.mrf.mxu1 }
  0xf7   :  { %v3001_v29 = vpop.f32.mrf.mxu0  ;;  %v981_v49 = vsel %vm935_vm2, %v3009_v33, -inf }
  0xf8   :  { %937 = vmax.xlane.f32.xlu0 %v936_v24  ;;  %976 = vmax.xlane.f32.xlu1 %v975_v23  ;;  %v969_v35 = vsel %vm935_vm2, %v3001_v29, -inf  ;;  %v3021_v38 = vpop.f32.mrf.mxu1 }
  0xf9   :  { %v3007_v32 = vpop.f32.mrf.mxu0  ;;  %v978_v43 = vsel %vm935_vm2, %v3021_v38, -inf }
  0xfa   :  { %v966_v36 = vsel %vm935_vm2, %v3007_v32, -inf }
  0xfc   :  { %946 = vmax.xlane.f32.xlu0 %v945_v26  ;;  %961 = vmax.xlane.f32.xlu1 %v960_v27 }
 0x100   :  { %964 = vmax.xlane.f32.xlu0 %v963_v30  ;;  %973 = vmax.xlane.f32.xlu1 %v972_v31 }
 0x104   :  { %970 = vmax.xlane.f32.xlu0 %v969_v35  ;;  %967 = vmax.xlane.f32.xlu1 %v966_v36 }
 0x108   :  { %933 = vmax.xlane.f32.xlu0 %v932_v42  ;;  %979 = vmax.xlane.f32.xlu1 %v978_v43 }
 0x10c   :  { %982 = vmax.xlane.f32.xlu1 %v981_v49 }
 0x155   :  { %v904_v1 = vpop.xlane.xlu0 %903  ;;  %v892_v4 = vpop.xlane.xlu1 %891 }
 0x159   :  { %v901_v5 = vpop.xlane.xlu1 %900  ;;  %v889_v9 = vpop.xlane.xlu0 %888 }
 0x15d   :  { %v3059_v10 = vpop.xlane.xlu0 %897  ;;  %v907_v13 = vpop.xlane.xlu1 %906 }
 0x161   :  { %v910_v14 = vpop.xlane.xlu0 %909  ;;  %v3061_v16 = vpop.xlane.xlu1 %924 }
 0x165   :  { %v895_v17 = vpop.xlane.xlu0 %894  ;;  %v3063_v19 = vpop.xlane.xlu1 %930 }
 0x169   :  { %v3065_v20 = vpop.xlane.xlu0 %915 }
 0x16d   :  { %v953_v23 = vpop.xlane.xlu1 %952  ;;  %v928_v24 = vpop.xlane.xlu0 %927 }
 0x16e   :  { %v989_v26 = vmax.f32 %v904_v1, %v953_v23 }
 0x170   :  { %v1005_v27 = vsub.f32 %v2897_v41, %v989_v26  ;;  %v1053_v30 = vsub.f32 %v2949_v3, %v989_v26 }
 0x171   :  { %v950_v31 = vpop.xlane.xlu1 %949  ;;  %v913_v34 = vpop.xlane.xlu0 %912 }
 0x172   :  { %v1026_v35 = vmul.f32 1.442695, %v1005_v27  ;;  %v988_v36 = vmax.f32 %v901_v5, %v950_v31  ;;  %v1074_v37 = vmul.f32 1.442695, %v1053_v30 }
 0x174   :  { %2494 = vpow2.f32 %v1026_v35  ;;  %v1004_v39 = vsub.f32 %v2903_v44, %v988_v36  ;;  %v1052_v42 = vsub.f32 %v2957_v7, %v988_v36 }
 0x175   :  { %v959_v43 = vpop.xlane.xlu1 %958  ;;  %v3071_v46 = vpop.xlane.xlu0 %921  ;;  %2496 = vpow2.f32 %v1074_v37 }
 0x176   :  { %v1024_v49 = vmul.f32 1.442695, %v1004_v39  ;;  %v1072_v51 = vmul.f32 1.442695, %v1052_v42  ;;  %v991_v54 = vmax.f32 %v910_v14, %v959_v43 }
 0x178   :  { %2498 = vpow2.f32 %v1024_v49  ;;  %v1007_v41 = vsub.f32 %v2909_v47, %v991_v54  ;;  %v1055_v3 = vsub.f32 %v2965_v11, %v991_v54 }
 0x179   :  { %2500 = vpow2.f32 %v1072_v51  ;;  %v3075_v58 = vpop.xlane.xlu0 %918  ;;  %v944_v59 = vpop.xlane.xlu1 %943 }
 0x17a   :  { %v1030_v1 = vmul.f32 1.442695, %v1007_v41  ;;  %v1078_v44 = vmul.f32 1.442695, %v1055_v3  ;;  %v3077_v7 = vmax.f32 %v895_v17, %v944_v59 }
 0x17c   :  { %2502 = vpow2.f32 %v1030_v1  ;;  %v1050_v47 = vsub.f32 %v2973_v15, %v3077_v7 }
 0x17d   :  { %v941_v5 = vpop.xlane.xlu0 %940  ;;  %v956_v23 = vpop.xlane.xlu1 %955  ;;  %2504 = vpow2.f32 %v1078_v44 }
 0x17e   :  { %v3079_v26 = vmax.f32 %v892_v4, %v941_v5  ;;  %v990_v14 = vmax.f32 %v907_v13, %v956_v23  ;;  %v1068_v42 = vmul.f32 1.442695, %v1050_v47 }
 0x180   :  { %v1006_v11 = vsub.f32 %v2915_v50, %v990_v14  ;;  %v1054_v30 = vsub.f32 %v2979_v18, %v990_v14  ;;  %v1049_v17 = vsub.f32 %v2955_v6, %v3079_v26 }
 0x181   :  { %v3084_v27 = vpop.eup %2494  ;;  %v938_v31 = vpop.xlane.xlu0 %937 }
 0x182   :  { %v977_v35 = vpop.xlane.xlu1 %976  ;;  %v1028_v36 = vmul.f32 1.442695, %v1006_v11  ;;  %v984_v37 = vmax.f32 %v889_v9, %v938_v31  ;;  %v1076_v4 = vmul.f32 1.442695, %v1054_v30  ;;  %v1111_v13 = vsel %vm886_vm1, %v3084_v27, 0.0  ;;  %v2497_v39 = vpop.eup %2496 }
 0x183   :  { %1112 = vadd.xlane.f32.xlu1 %v1111_v13  ;;  %v3095_v18 = vmax.f32 %v928_v24, %v977_v35  ;;  %v1066_v54 = vmul.f32 1.442695, %v1049_v17 }
 0x184   :  { %v1000_v15 = vsub.f32 %v2905_v45, %v984_v37  ;;  %v1048_v50 = vsub.f32 %v2959_v8, %v984_v37  ;;  %2506 = vpow2.f32 %v1028_v36  ;;  %v1159_v45 = vsel %vm935_vm2, %v2497_v39, 0.0  ;;  %v83_v8 = vld [vmem:[%s3367_s4 + $0x70] sm:$0xff] }
 0x185   :  { %v3093_v43 = vpop.eup %2498  ;;  %v947_v49 = vpop.xlane.xlu0 %946  ;;  %2508 = vpow2.f32 %v1076_v4  ;;  %v1061_v47 = vsub.f32 %v2985_v21, %v3095_v18  ;;  %v81_v21 = vld [vmem:[%s3367_s4 + $0x60] sm:$0xff] }
 0x186   :  { %v962_v51 = vpop.xlane.xlu1 %961  ;;  %v2501_v6 = vpop.eup %2500  ;;  %v1064_v9 = vmul.f32 1.442695, %v1048_v50  ;;  %v3098_v41 = vmax.f32 %v3059_v10, %v947_v49  ;;  %v1016_v3 = vmul.f32 1.442695, %v1000_v15  ;;  %2510 = vpow2.f32 %v1068_v42  ;;  %v3140_v42 = vld [vmem:[%s3366_s3 + $0x18] sm:$0xff] }
 0x187   :  { %v992_v59 = vmax.f32 %v913_v34, %v962_v51  ;;  %2415 = vmatprep.mubr.msk.f32.mxu1 %vm935_vm2, %v2501_v6  ;;  %v1108_v10 = vsel %vm886_vm1, %v3093_v43, 0.0  ;;  %1160 = vadd.xlane.f32.xlu1 %v1159_v45  ;;  %v1013_v34 = vsub.f32 %v2921_v53, %v3095_v18  ;;  %v1156_v35 = vsel %vm935_vm2, %v2501_v6, 0.0 }
 0x188   :  { %v1051_v24 = vsub.f32 %v2967_v12, %v3098_v41  ;;  %2416 = vmatmul.mubr.msk.f32.vlgmr.msra.gmra.mxu1 %vm935_vm2, %v2497_v39  ;;  %2512 = vpow2.f32 %v1064_v9  ;;  %1109 = vadd.xlane.f32.xlu0 %v1108_v10  ;;  %v82_v12 = vld [vmem:[%s3367_s4 + $0x68] sm:$0xff]  ;;  %v1090_v15 = vmul.f32 1.442695, %v1061_v47  ;;  %v1001_v9 = vsub.f32 %v2895_v40, %v3079_v26 }
 0x189   :  { %v3110_v1 = vpop.eup %2502  ;;  %v1008_v44 = vsub.f32 %v2937_v61, %v992_v59  ;;  %v1056_v5 = vsub.f32 %v2993_v25, %v992_v59  ;;  %v965_v23 = vpop.xlane.xlu0 %964  ;;  %2436 = vmatpush3.msra.mxu1 %v3055_v63  ;;  %2514 = vpow2.f32 %v1066_v54  ;;  %v1042_v36 = vmul.f32 1.442695, %v1013_v34 }
 0x18a   :  { %v974_v14 = vpop.xlane.xlu1 %973  ;;  %v1070_v11 = vmul.f32 1.442695, %v1051_v24  ;;  %v993_v53 = vmax.f32 %v3065_v20, %v965_v23  ;;  %2437 = vmatprep.subr.mxu1 %v83_v8  ;;  %2516 = vpow2.f32 %v1016_v3  ;;  %v1117_v17 = vsel %vm886_vm1, %v3110_v1, 0.0  ;;  %v2505_v20 = vpop.eup %2504 }
 0x18b   :  { %v1032_v61 = vmul.f32 1.442695, %v1008_v44  ;;  %v1080_v25 = vmul.f32 1.442695, %v1056_v5  ;;  %v996_v30 = vmax.f32 %v3061_v16, %v974_v14  ;;  %2438 = vmatpush3.msra.mxu1 %v83_v8  ;;  %1118 = vadd.xlane.f32.xlu1 %v1117_v17  ;;  %v1165_v18 = vsel %vm935_vm2, %v2505_v20, 0.0 }
 0x18c   :  { %v1009_v63 = vsub.f32 %v2927_v56, %v993_v53  ;;  %v1057_v31 = vsub.f32 %v2987_v22, %v993_v53  ;;  %2439 = vmatprep.subr.mxu1 %v82_v12  ;;  %2518 = vpow2.f32 %v1070_v11  ;;  %1157 = vadd.xlane.f32.xlu0 %v1156_v35  ;;  %v1018_v10 = vmul.f32 1.442695, %v1001_v9  ;;  %v65_v9 = vld [vmem:[%s3366_s3 + $0x20] sm:$0xff] }
 0x18d   :  { %v1012_v16 = vsub.f32 %v2925_v55, %v996_v30  ;;  %v1060_v37 = vsub.f32 %v2999_v28, %v996_v30  ;;  %v971_v56 = vpop.xlane.xlu0 %970  ;;  %2520 = vpow2.f32 %v1032_v61  ;;  %2440 = vmatpush3.msra.mxu1 %v82_v12  ;;  %v1003_v34 = vsub.f32 %v2911_v48, %v3098_v41  ;;  %v79_v48 = vld [vmem:[%s3367_s4 + $0x50] sm:$0xff] }
 0x18e   :  { %v968_v22 = vpop.xlane.xlu1 %967  ;;  %v1034_v4 = vmul.f32 1.442695, %v1009_v63  ;;  %v1082_v13 = vmul.f32 1.442695, %v1057_v31  ;;  %v3135_v39 = vmax.f32 %v3071_v46, %v971_v56  ;;  %2522 = vpow2.f32 %v1080_v25  ;;  %2441 = vmatprep.subr.mxu1 %v81_v21 }
 0x18f   :  { %v1088_v55 = vmul.f32 1.442695, %v1060_v37  ;;  %v994_v28 = vmax.f32 %v3075_v58, %v968_v22  ;;  %2442 = vmatpush3.msra.mxu1 %v81_v21  ;;  %v1040_v46 = vmul.f32 1.442695, %v1012_v16  ;;  %1166 = vadd.xlane.f32.xlu1 %v1165_v18  ;;  %v1002_v58 = vsub.f32 %v2919_v52, %v3077_v7 }
 0x190   :  { %2524 = vpow2.f32 %v1034_v4  ;;  %v1059_v50 = vsub.f32 %v3001_v29, %v3135_v39  ;;  %2459 = vmatprep.subr.mxu1 %v3140_v42  ;;  %v1011_v5 = vsub.f32 %v2943_v0, %v3135_v39  ;;  %v1022_v11 = vmul.f32 1.442695, %v1003_v34 }
 0x191   :  { %2526 = vpow2.f32 %v1082_v13  ;;  %v1058_v49 = vsub.f32 %v3007_v32, %v994_v28  ;;  %v3153_v29 = vpop.eup %2506  ;;  %v1010_v59 = vsub.f32 %v2947_v2, %v994_v28  ;;  %v1020_v8 = vmul.f32 1.442695, %v1002_v58 }
 0x192   :  { %v980_v51 = vpop.xlane.xlu1 %979  ;;  %2528 = vpow2.f32 %v1042_v36  ;;  %v1086_v6 = vmul.f32 1.442695, %v1059_v50  ;;  %v2509_v32 = vpop.eup %2508  ;;  %v1114_v52 = vsel %vm886_vm1, %v3153_v29, 0.0  ;;  %v1038_v61 = vmul.f32 1.442695, %v1011_v5 }
 0x193   :  { %v3151_v54 = vmax.f32 %v3063_v19, %v980_v51  ;;  %2530 = vpow2.f32 %v1088_v55  ;;  %v1084_v3 = vmul.f32 1.442695, %v1058_v49  ;;  %v3162_v7 = vpop.eup %2510  ;;  %v934_v19 = vpop.xlane.xlu0 %933  ;;  %2418 = vmatprep.mubr.msk.f32.mxu1 %vm935_vm2, %v2509_v32  ;;  %1115 = vadd.xlane.f32.xlu0 %v1114_v52  ;;  %v1036_v23 = vmul.f32 1.442695, %v1010_v59 }
 0x194   :  { %2532 = vpow2.f32 %v1090_v15  ;;  %2419 = vmatmul.mubr.msk.f32.gmra.mxu1 %vm935_vm2, %v2505_v20  ;;  %v1162_v12 = vsel %vm935_vm2, %v2509_v32, 0.0  ;;  %v62_v20 = vld [vmem:[%s3366_s3 + $0x8] sm:$0xff]  ;;  %v63_v15 = vld [vmem:[%s3366_s3 + $0x10] sm:$0xff] }
 0x195   :  { %v1062_v45 = vsub.f32 %v3021_v38, %v3151_v54  ;;  %2534 = vpow2.f32 %v1040_v46  ;;  %v3165_v26 = vpop.eup %2512  ;;  %v1014_v63 = vsub.f32 %v2935_v60, %v3151_v54 }
 0x196   :  { %v983_v40 = vpop.xlane.xlu1 %982  ;;  %2536 = vpow2.f32 %v1086_v6  ;;  %v3170_v38 = vpop.eup %2514  ;;  %2401 = vmatprep.mubr.msk.f32.mxu0 %vm935_vm2, %v3165_v26 }
 0x197   :  { %v1092_v24 = vmul.f32 1.442695, %v1062_v45  ;;  %v3168_v2 = vmax.f32 %v934_v19, %v983_v40  ;;  %2538 = vpow2.f32 %v1084_v3  ;;  %v3176_v44 = vpop.eup %2516  ;;  %2402 = vmatmul.mubr.msk.f32.vlgmr.msra.gmra.mxu0 %vm935_vm2, %v3170_v38  ;;  %1163 = vadd.xlane.f32.xlu0 %v1162_v12  ;;  %v1044_v16 = vmul.f32 1.442695, %v1014_v63  ;;  %v68_v45 = vld [vmem:[%s3366_s3 + $0x38] sm:$0xff]  ;;  %v67_v19 = vld [vmem:[%s3366_s3 + $0x30] sm:$0xff] }
 0x198   :  { %2404 = vmatprep.mubr.msk.f32.mxu0 %vm935_vm2, %v3162_v7  ;;  %2422 = vmatpush3.msra.mxu0 %v3050_v62  ;;  %v77_v62 = vld [vmem:[%s3367_s4 + $0x40] sm:$0xff] }
 0x199   :  { %v1063_v14 = vsub.f32 %v3009_v33, %v3168_v2  ;;  %2540 = vpow2.f32 %v1092_v24  ;;  %v3190_v41 = vpop.eup %2518  ;;  %v78_v33 = vld [vmem:[%s3367_s4 + $0x48] sm:$0xff]  ;;  %2423 = vmatprep.subr.mxu0 %v79_v48  ;;  %v1015_v60 = vsub.f32 %v2929_v57, %v3168_v2  ;;  %v61_v57 = vld [vmem:[%s3366_s3] sm:$0xff]  ;;  %v1096_v2 = vsel %vm886_vm1, %v3176_v44, 0.0 }
 0x19a   :  { %2542 = vpow2.f32 %v1020_v8  ;;  %v3196_v47 = vpop.eup %2520  ;;  %2424 = vmatpush3.msra.mxu0 %v79_v48  ;;  %v1153_v12 = vsel %vm935_vm2, %v3190_v41, 0.0 }
 0x19b   :  { %v1094_v0 = vmul.f32 1.442695, %v1063_v14  ;;  %2544 = vpow2.f32 %v1018_v10  ;;  %v2523_v53 = vpop.eup %2522  ;;  %v1120_v25 = vsel %vm886_vm1, %v3196_v47, 0.0  ;;  %2405 = vmatmul.mubr.msk.f32.gmra.mxu0 %vm935_vm2, %v3190_v41  ;;  %2425 = vmatprep.subr.mxu0 %v78_v33  ;;  %v1046_v39 = vmul.f32 1.442695, %v1015_v60 }
 0x19c   :  { %2546 = vpow2.f32 %v1036_v23  ;;  %1121 = vadd.xlane.f32.xlu0 %v1120_v25  ;;  %2426 = vmatpush3.msra.mxu0 %v78_v33  ;;  %v1168_v37 = vsel %vm935_vm2, %v2523_v53, 0.0  ;;  %v1144_v23 = vsel %vm935_vm2, %v3165_v26, 0.0  ;;  %v1147_v14 = vsel %vm935_vm2, %v3170_v38, 0.0 }
 0x19d   :  { %v3203_v30 = vpop.eup %2524  ;;  %2548 = vpow2.f32 %v1094_v0  ;;  %2429 = vmatprep.mubr.msk.f32.mxu0 %vm935_vm2, %v2523_v53  ;;  %2427 = vmatprep.subr.mxu0 %v77_v62 }
 0x19e   :  { %v2527_v31 = vpop.eup %2526  ;;  %v1123_v35 = vsel %vm886_vm1, %v3203_v30, 0.0  ;;  %2550 = vpow2.f32 %v1022_v11  ;;  %2428 = vmatpush3.msra.mxu0 %v77_v62 }
 0x19f   :  { %v3211_v17 = vpop.eup %2528  ;;  %2552 = vpow2.f32 %v1038_v61  ;;  %1124 = vadd.xlane.f32.xlu1 %v1123_v35  ;;  %2430 = vmatmul.mubr.msk.f32.vlgmr.msra.gmra.mxu0 %vm935_vm2, %v2527_v31  ;;  %v1171_v4 = vsel %vm935_vm2, %v2527_v31, 0.0 }
 0x1a0   :  { %v2531_v21 = vpop.eup %2530  ;;  %1169 = vadd.xlane.f32.xlu0 %v1168_v37  ;;  %2449 = vmatprep.subr.mxu0 %v62_v20  ;;  %2554 = vpow2.f32 %v1044_v16  ;;  %v1135_v18 = vsel %vm886_vm1, %v3211_v17, 0.0 }
 0x1a1   :  { %v2533_v36 = vpop.eup %2532  ;;  %2443 = vmatprep.mubr.msk.f32.mxu1 %vm935_vm2, %v2531_v21  ;;  %2450 = vmatpush3.msra.mxu0 %v62_v20  ;;  %2556 = vpow2.f32 %v1046_v39  ;;  %v1180_v51 = vsel %vm935_vm2, %v2531_v21, 0.0 }
 0x1a2   :  { %v3222_v56 = vpop.eup %2534  ;;  %2444 = vmatmul.mubr.msk.f32.vlgmr.msra.gmra.mxu1 %vm935_vm2, %v2533_v36  ;;  %2451 = vmatprep.subr.mxu0 %v61_v57  ;;  %v1183_v6 = vsel %vm935_vm2, %v2533_v36, 0.0 }
 0x1a3   :  { %v2537_v22 = vpop.eup %2536  ;;  %2460 = vmatpush3.msra.mxu1 %v3140_v42  ;;  %1172 = vadd.xlane.f32.xlu1 %v1171_v4  ;;  %v1132_v55 = vsel %vm886_vm1, %v3222_v56, 0.0  ;;  %v66_v42 = vld [vmem:[%s3366_s3 + $0x28] sm:$0xff]  ;;  %s2612_s3 = smov 8  }
 0x1a4   :  { %v2539_v13 = vpop.eup %2538  ;;  %1133 = vadd.xlane.f32.xlu0 %v1132_v55  ;;  %2452 = vmatpush3.msra.mxu0 %v61_v57 }
 0x1a5   :  { %2432 = vmatprep.mubr.msk.f32.mxu0 %vm935_vm2, %v2539_v13  ;;  %2461 = vmatprep.subr.mxu1 %v63_v15 }
 0x1a6   :  { %v2541_v28 = vpop.eup %2540  ;;  %2433 = vmatmul.mubr.msk.f32.gmra.mxu0 %vm935_vm2, %v2537_v22  ;;  %2469 = vmatprep.subr.mxu0 %v66_v42 }
 0x1a7   :  { %v3240_v50 = vpop.eup %2542  ;;  %2453 = vmatprep.mubr.msk.f32.mxu0 %vm886_vm1, %v3176_v44  ;;  %2446 = vmatprep.mubr.msk.f32.mxu1 %vm935_vm2, %v2541_v28  ;;  %v1186_v8 = vsel %vm935_vm2, %v2541_v28, 0.0  ;;  %v1150_v44 = vsel %vm935_vm2, %v3162_v7, 0.0 }
 0x1a8   :  { %v2545_v46 = vpop.eup %2544  ;;  %1136 = vadd.xlane.f32.xlu1 %v1135_v18  ;;  %1181 = vadd.xlane.f32.xlu0 %v1180_v51  ;;  %v1102_v34 = vsel %vm886_vm1, %v3240_v50, 0.0 }
 0x1a9   :  { %v2547_v49 = vpop.eup %2546  ;;  %2462 = vmatpush3.msra.mxu1 %v63_v15  ;;  %v1099_v10 = vsel %vm886_vm1, %v2545_v46, 0.0 }
 0x1aa   :  { %v2549_v58 = vpop.eup %2548  ;;  %2454 = vmatmul.mubr.msk.f32.vlgmr.msra.gmra.mxu0 %vm886_vm1, %v2545_v46  ;;  %v1126_v32 = vsel %vm886_vm1, %v2547_v49, 0.0  ;;  %2479 = vmatprep.subr.mxu1 %v68_v45 }
 0x1ab   :  { %2456 = vmatprep.mubr.msk.f32.mxu0 %vm886_vm1, %v3240_v50  ;;  %2447 = vmatmul.mubr.msk.f32.gmra.mxu1 %vm935_vm2, %v2549_v58  ;;  %v2551_v54 = vpop.eup %2550  ;;  %v1189_v24 = vsel %vm935_vm2, %v2549_v58, 0.0 }
 0x1ac   :  { %1184 = vadd.xlane.f32.xlu1 %v1183_v6  ;;  %v2553_v3 = vpop.eup %2552  ;;  %2463 = vmatprep.mubr.msk.f32.mxu1 %vm886_vm1, %v3093_v43  ;;  %v1174_v43 = vsel %vm935_vm2, %v2539_v13, 0.0  ;;  %v1105_v5 = vsel %vm886_vm1, %v2551_v54, 0.0 }
 0x1ad   :  { %2470 = vmatpush3.msra.mxu0 %v66_v42  ;;  %1127 = vadd.xlane.f32.xlu0 %v1126_v32  ;;  %v1129_v59 = vsel %vm886_vm1, %v2553_v3, 0.0  ;;  %v2555_v52 = vpop.eup %2554 }
 0x1ae   :  { %2457 = vmatmul.mubr.msk.f32.gmra.mxu0 %vm886_vm1, %v2551_v54  ;;  %2471 = vmatprep.subr.mxu0 %v65_v9  ;;  %v2557_v40 = vpop.eup %2556 }
 0x1af   :  { %2473 = vmatprep.mubr.msk.f32.mxu0 %vm886_vm1, %v3196_v47  ;;  %2464 = vmatmul.mubr.msk.f32.vlgmr.msra.gmra.mxu1 %vm886_vm1, %v3084_v27  ;;  %v1177_v27 = vsel %vm935_vm2, %v2537_v22, 0.0 }
 0x1b0   :  { %2472 = vmatpush3.msra.mxu0 %v65_v9  ;;  %1130 = vadd.xlane.f32.xlu1 %v1129_v59 }
 0x1b1   :  { %2466 = vmatprep.mubr.msk.f32.mxu1 %vm886_vm1, %v3153_v29  ;;  %1175 = vadd.xlane.f32.xlu0 %v1174_v43  ;;  %v1138_v29 = vsel %vm886_vm1, %v2555_v52, 0.0 }
 0x1b2   :  { %2474 = vmatmul.mubr.msk.f32.vlgmr.msra.gmra.mxu0 %vm886_vm1, %v3203_v30  ;;  %2480 = vmatpush3.msra.mxu1 %v68_v45 }
 0x1b3   :  { %2476 = vmatprep.mubr.msk.f32.mxu0 %vm886_vm1, %v2547_v49  ;;  %2467 = vmatmul.mubr.msk.f32.gmra.mxu1 %vm886_vm1, %v3110_v1  ;;  %v1141_v1 = vsel %vm886_vm1, %v2557_v40, 0.0 }
 0x1b4   :  { %1178 = vadd.xlane.f32.xlu1 %v1177_v27  ;;  %2483 = vmatprep.mubr.msk.f32.mxu1 %vm886_vm1, %v3222_v56 }
 0x1b5   :  { %1139 = vadd.xlane.f32.xlu0 %v1138_v29  ;;  %2481 = vmatprep.subr.mxu1 %v67_v19 }
 0x1b6   :  { %2477 = vmatmul.mubr.msk.f32.gmra.mxu0 %vm886_vm1, %v2553_v3  ;;  %2482 = vmatpush3.msra.mxu1 %v67_v19 }
 0x1b7   :  { %2484 = vmatmul.mubr.msk.f32.vlgmr.msra.gmra.mxu1 %vm886_vm1, %v3211_v17 }
 0x1b8   :  { %1142 = vadd.xlane.f32.xlu1 %v1141_v1  ;;  %2486 = vmatprep.mubr.msk.f32.mxu1 %vm886_vm1, %v2555_v52 }
 0x1b9   :  { %1187 = vadd.xlane.f32.xlu0 %v1186_v8 }
 0x1bb   :  { %2487 = vmatmul.mubr.msk.f32.gmra.mxu1 %vm886_vm1, %v2557_v40 }
 0x1bc   :  { %1190 = vadd.xlane.f32.xlu1 %v1189_v24 }
 0x1bd   :  { %1097 = vadd.xlane.f32.xlu0 %v1096_v2 }
 0x1c0   :  { %1100 = vadd.xlane.f32.xlu1 %v1099_v10 }
 0x1c1   :  { %1103 = vadd.xlane.f32.xlu0 %v1102_v34 }
 0x1c4   :  { %1106 = vadd.xlane.f32.xlu1 %v1105_v5 }
 0x1c5   :  { %1145 = vadd.xlane.f32.xlu0 %v1144_v23 }
 0x1c8   :  { %1148 = vadd.xlane.f32.xlu1 %v1147_v14 }
 0x1c9   :  { %1151 = vadd.xlane.f32.xlu0 %v1150_v44 }
 0x1cc   :  { %1154 = vadd.xlane.f32.xlu1 %v1153_v12 }
 0x20c   :  { %v1113_v0 = vpop.xlane.xlu1 %1112 }
 0x210   :  { %v1161_v47 = vpop.xlane.xlu1 %1160 }
 0x211   :  { %v1110_v48 = vpop.xlane.xlu0 %1109  ;;  %v1197_v56 = vadd.f32 %v1161_v47, %v1113_v0 }
 0x213   :  { %2558 = vrcp.f32 %v1197_v56 }
 0x214   :  { %v1119_v26 = vpop.xlane.xlu1 %1118 }
 0x215   :  { %v1158_v33 = vpop.xlane.xlu0 %1157 }
 0x216   :  { %v1196_v4 = vadd.f32 %v1158_v33, %v1110_v48 }
 0x218   :  { %v1167_v61 = vpop.xlane.xlu1 %1166  ;;  %2560 = vrcp.f32 %v1196_v4 }
 0x219   :  { %v1199_v55 = vadd.f32 %v1167_v61, %v1119_v26 }
 0x21b   :  { %2562 = vrcp.f32 %v1199_v55 }
 0x21c   :  { %v1116_v11 = vpop.xlane.xlu0 %1115 }
 0x220   :  { %v1164_v53 = vpop.xlane.xlu0 %1163  ;;  %v2559_v34 = vpop.eup %2558 }
 0x221   :  { %v1198_v46 = vadd.f32 %v1164_v53, %v1116_v11 }
 0x225   :  { %v1122_v25 = vpop.xlane.xlu0 %1121  ;;  %v2561_v12 = vpop.eup %2560 }
 0x228   :  { %v1125_v62 = vpop.xlane.xlu1 %1124  ;;  %v2563_v61 = vpop.eup %2562 }
 0x229   :  { %v1170_v38 = vpop.xlane.xlu0 %1169 }
 0x22a   :  { %v1200_v50 = vadd.f32 %v1170_v38, %v1122_v25 }
 0x22c   :  { %v1173_v30 = vpop.xlane.xlu1 %1172  ;;  %2564 = vrcp.f32 %v1200_v50 }
 0x22d   :  { %v1134_v63 = vpop.xlane.xlu0 %1133  ;;  %2566 = vrcp.f32 %v1198_v46  ;;  %v1201_v59 = vadd.f32 %v1173_v30, %v1125_v62 }
 0x231   :  { %v1137_v7 = vpop.xlane.xlu1 %1136  ;;  %v1182_v31 = vpop.xlane.xlu0 %1181 }
 0x232   :  { %v1204_v3 = vadd.f32 %v1182_v31, %v1134_v63 }
 0x234   :  { %2568 = vrcp.f32 %v1204_v3 }
 0x235   :  { %v1185_v41 = vpop.xlane.xlu1 %1184  ;;  %2570 = vrcp.f32 %v1201_v59 }
 0x236   :  { %v1128_v36 = vpop.xlane.xlu0 %1127  ;;  %v1205_v27 = vadd.f32 %v1185_v41, %v1137_v7 }
 0x238   :  { %2572 = vrcp.f32 %v1205_v27 }
 0x239   :  { %v1131_v22 = vpop.xlane.xlu1 %1130  ;;  %v2565_v7 = vpop.eup %2564 }
 0x23a   :  { %v1176_v28 = vpop.xlane.xlu0 %1175 }
 0x23b   :  { %v1202_v29 = vadd.f32 %v1176_v28, %v1128_v36 }
 0x23d   :  { %v1179_v49 = vpop.xlane.xlu1 %1178  ;;  %2574 = vrcp.f32 %v1202_v29 }
 0x23e   :  { %v1140_v6 = vpop.xlane.xlu0 %1139  ;;  %v1203_v47 = vadd.f32 %v1179_v49, %v1131_v22 }
 0x241   :  { %v1143_v19 = vpop.xlane.xlu1 %1142 }
 0x242   :  { %v1188_v24 = vpop.xlane.xlu0 %1187 }
 0x243   :  { %v1206_v48 = vadd.f32 %v1188_v24, %v1140_v6 }
 0x245   :  { %v1191_v25 = vpop.xlane.xlu1 %1190  ;;  %2576 = vrcp.f32 %v1206_v48 }
 0x246   :  { %2578 = vrcp.f32 %v1203_v47  ;;  %v1207_v31 = vadd.f32 %v1191_v25, %v1143_v19  ;;  %v1098_v27 = vpop.xlane.xlu0 %1097 }
 0x248   :  { %v2417_v17 = vpop.f32.mrf.mxu1  ;;  %2580 = vrcp.f32 %v1207_v31 }
 0x24a   :  { %v1399_v60 = vpop.f32.mrf.mxu1  ;;  %v1104_v19 = vpop.xlane.xlu0 %1103 }
 0x24e   :  { %v1146_v29 = vpop.xlane.xlu0 %1145 }
 0x252   :  { %v1152_v24 = vpop.xlane.xlu0 %1151 }
 0x254   :  { %v2420_v16 = vpop.f32.mrf.mxu1 }
 0x256   :  { %v1409_v13 = vpop.f32.mrf.mxu1 }
 0x257   :  { %v2403_v35 = vpop.f32.mrf.mxu0 }
 0x259   :  { %v1302_v21 = vpop.f32.mrf.mxu0 }
 0x25b   :  { %v2406_v20 = vpop.f32.mrf.mxu0 }
 0x25d   :  { %v1312_v37 = vpop.f32.mrf.mxu0 }
 0x25f   :  { %v3305_v57 = vpop.f32.mrf.mxu0 }
 0x261   :  { %v1496_v39 = vpop.f32.mrf.mxu0 }
 0x262   :  { %v3307_v15 = vpop.f32.mrf.mxu1 }
 0x264   :  { %v1593_v51 = vpop.f32.mrf.mxu1 }
 0x266   :  { %v3309_v42 = vpop.f32.mrf.mxu0 }
 0x268   :  { %v3311_v18 = vpop.f32.mrf.mxu0 }
 0x26a   :  { %v2455_v58 = vpop.f32.mrf.mxu0 }
 0x26b   :  { %v3313_v54 = vadd.f32 %v2455_v58, %v2403_v35  ;;  %v3315_v9 = vpop.f32.mrf.mxu1 }
 0x26c   :  { %v1690_v32 = vpop.f32.mrf.mxu0 }
 0x26d   :  { %v3317_v45 = vadd.f32 %v1690_v32, %v1302_v21  ;;  %v3319_v43 = vpop.f32.mrf.mxu1  ;;  %v2567_v21 = vpop.eup %2566 }
 0x26e   :  { %v2458_v52 = vpop.f32.mrf.mxu0 }
 0x26f   :  { %v3321_v40 = vadd.f32 %v2458_v52, %v2406_v20  ;;  %v2465_v8 = vpop.f32.mrf.mxu1 }
 0x270   :  { %v1700_v1 = vpop.f32.mrf.mxu0  ;;  %v1793_v10 = vadd.f32 %v2465_v8, %v2417_v17 }
 0x271   :  { %v3323_v2 = vadd.f32 %v1700_v1, %v1312_v37  ;;  %v1787_v23 = vpop.f32.mrf.mxu1  ;;  %v2569_v37 = vpop.eup %2568  ;;  %v1192_v1 = vadd.f32 %v1146_v29, %v1098_v27 }
 0x272   :  { %v2475_v5 = vpop.f32.mrf.mxu0  ;;  %v2005_v14 = vmul.f32 %v2559_v34, %v1793_v10  ;;  %v1788_v44 = vadd.f32 %v1787_v23, %v1399_v60  ;;  %v2571_v22 = vpop.eup %2570 }
 0x273   :  { %v2468_v33 = vpop.f32.mrf.mxu1  ;;  %v1890_v41 = vadd.f32 %v2475_v5, %v3305_v57  ;;  %v2573_v28 = vpop.eup %2572  ;;  %2582 = vrcp.f32 %v1192_v1  ;;  %v1194_v5 = vadd.f32 %v1152_v24, %v1104_v19 }
 0x274   :  { %v1884_v0 = vpop.f32.mrf.mxu0  ;;  %v2004_v11 = vmul.f32 %v2561_v12, %v1788_v44  ;;  %v1803_v53 = vadd.f32 %v2468_v33, %v2420_v16  ;;  %2022 = vrot.lane.b32.xlu1 %v2005_v14, %s2612_s3  ;;  %v2575_v50 = vpop.eup %2574 }
 0x275   :  { %v1885_v26 = vadd.f32 %v1884_v0, %v1496_v39  ;;  %v1797_v62 = vpop.f32.mrf.mxu1  ;;  %v2009_v39 = vmul.f32 %v2571_v22, %v1890_v41 }
 0x276   :  { %v2007_v38 = vmul.f32 %v2563_v61, %v1803_v53  ;;  %v2478_v30 = vpop.f32.mrf.mxu0  ;;  %v1798_v63 = vadd.f32 %v1797_v62, %v1409_v13  ;;  %2020 = vrot.lane.b32.xlu0 %v2004_v11, %s2612_s3 }
 0x277   :  { %v2008_v35 = vmul.f32 %v2565_v7, %v1885_v26  ;;  %v2485_v17 = vpop.f32.mrf.mxu1 }
 0x278   :  { %2026 = vrot.lane.b32.xlu1 %v2007_v38, %s2612_s3  ;;  %v2006_v60 = vmul.f32 %v2567_v21, %v1798_v63  ;;  %v1894_v20 = vpop.f32.mrf.mxu0  ;;  %v1987_v55 = vadd.f32 %v2485_v17, %v3307_v15 }
 0x279   :  { %v1981_v36 = vpop.f32.mrf.mxu1  ;;  %v1895_v4 = vadd.f32 %v1894_v20, %v3311_v18  ;;  %v2577_v18 = vpop.eup %2576 }
 0x27a   :  { %2036 = vrot.lane.b32.xlu0 %v2008_v35, %s2613_s11  ;;  %v1982_v16 = vadd.f32 %v1981_v36, %v1593_v51  ;;  %v1900_v51 = vadd.f32 %v2478_v30, %v3309_v42  ;;  %v2013_v58 = vmul.f32 %v2573_v28, %v1987_v55  ;;  %v2579_v6 = vpop.eup %2578 }
 0x27b   :  { %v2488_v56 = vpop.f32.mrf.mxu1  ;;  %v2010_v46 = vmul.f32 %v2575_v50, %v1895_v4  ;;  %v2581_v59 = vpop.eup %2580 }
 0x27c   :  { %2024 = vrot.lane.b32.xlu1 %v2006_v60, %s2612_s3  ;;  %v2012_v13 = vmul.f32 %v2569_v37, %v1982_v16  ;;  %v2011_v15 = vmul.f32 %v2579_v6, %v1900_v51  ;;  %v1997_v32 = vadd.f32 %v2488_v56, %v3315_v9 }
 0x27d   :  { %v1991_v57 = vpop.f32.mrf.mxu1 }
 0x27e   :  { %2052 = vrot.lane.b32.xlu0 %v2012_v13, %s2614_s12  ;;  %v1992_v49 = vadd.f32 %v1991_v57, %v3319_v43  ;;  %v2015_v52 = vmul.f32 %v2581_v59, %v1997_v32  ;;  %v1101_v43 = vpop.xlane.xlu1 %1100 }
 0x280   :  { %2038 = vrot.lane.b32.xlu1 %v2009_v39, %s2613_s11  ;;  %v2014_v3 = vmul.f32 %v2577_v18, %v1992_v49  ;;  %v2583_v48 = vpop.eup %2582 }
 0x281   :  { %v2000_v0 = vmul.f32 %v2583_v48, %v3317_v45 }
 0x282   :  { %2040 = vrot.lane.b32.xlu0 %v2010_v46, %s2613_s11  ;;  %v1107_v42 = vpop.xlane.xlu1 %1106 }
 0x284   :  { %2054 = vrot.lane.b32.xlu1 %v2013_v58, %s2614_s12 }
 0x286   :  { %2056 = vrot.lane.b32.xlu0 %v2014_v3, %s2614_s12  ;;  %v1149_v8 = vpop.xlane.xlu1 %1148 }
 0x287   :  { %v1193_v10 = vadd.f32 %v1149_v8, %v1101_v43 }
 0x288   :  { %2042 = vrot.lane.b32.xlu1 %v2011_v15, %s2613_s11 }
 0x289   :  { %2584 = vrcp.f32 %v1193_v10 }
 0x28a   :  { %v1155_v34 = vpop.xlane.xlu1 %1154  ;;  %2586 = vrcp.f32 %v1194_v5 }
 0x28b   :  { %v1195_v14 = vadd.f32 %v1155_v34, %v1107_v42 }
 0x28c   :  { %2058 = vrot.lane.b32.xlu1 %v2015_v52, %s2614_s12 }
 0x28d   :  { %2588 = vrcp.f32 %v1195_v14 }
 0x296   :  { %v2585_v53 = vpop.eup %2584 }
 0x297   :  { %v2001_v62 = vmul.f32 %v2585_v53, %v3313_v54  ;;  %v2587_v38 = vpop.eup %2586 }
 0x298   :  { %v2002_v45 = vmul.f32 %v2587_v38, %v3323_v2 }
 0x29a   :  { %v2589_v41 = vpop.eup %2588 }
 0x29b   :  { %v2003_v36 = vmul.f32 %v2589_v41, %v3321_v40 }
 0x2e6   :  { %v2023_v9 = vpop.permute.xlu1 %2022 }
 0x2e7   :  { %v2065_v30 = vsel %vm85_vm0, %v2001_v62, %v2023_v9 }
 0x2e8   :  { %v2021_v23 = vpop.permute.xlu0 %2020 }
 0x2e9   :  { %v2064_v47 = vsel %vm85_vm0, %v2000_v0, %v2021_v23 }
 0x2ea   :  { %v2027_v44 = vpop.permute.xlu1 %2026 }
 0x2eb   :  { %v2067_v2 = vsel %vm85_vm0, %v2003_v36, %v2027_v44 }
 0x2ec   :  { %v2037_v12 = vpop.permute.xlu0 %2036 }
 0x2ed   :  { %v2068_v11 = vsel %vm886_vm1, %v2064_v47, %v2037_v12 }
 0x2ee   :  { %v2025_v33 = vpop.permute.xlu1 %2024 }
 0x2ef   :  { %v2066_v17 = vsel %vm85_vm0, %v2002_v45, %v2025_v33 }
 0x2f0   :  { %v2053_v26 = vpop.permute.xlu0 %2052 }
 0x2f1   :  { %v2073_v61 = vsel %vm2072_vm3, %v2068_v11, %v2053_v26 }
 0x2f2   :  { %v2039_v25 = vpop.permute.xlu1 %2038  ;;  %2077 = vst.msk [vmem:[#allocation2] sm:$0xff] %vm935_vm2, %v2073_v61 }
 0x2f3   :  { %v2069_v7 = vsel %vm886_vm1, %v2065_v30, %v2039_v25 }
 0x2f4   :  { %v2041_v63 = vpop.permute.xlu0 %2040 }
 0x2f5   :  { %v2070_v21 = vsel %vm886_vm1, %v2066_v17, %v2041_v63 }
 0x2f6   :  { %v2055_v31 = vpop.permute.xlu1 %2054 }
 0x2f7   :  { %v2074_v35 = vsel %vm2072_vm3, %v2069_v7, %v2055_v31 }
 0x2f8   :  { %2078 = vst.msk [vmem:[#allocation2 + $0x8] sm:$0xff] %vm935_vm2, %v2074_v35  ;;  %v2057_v54 = vpop.permute.xlu0 %2056 }
 0x2f9   :  { %v2075_v60 = vsel %vm2072_vm3, %v2070_v21, %v2057_v54 }
 0x2fa   :  { %v2043_v20 = vpop.permute.xlu1 %2042  ;;  %2079 = vst.msk [vmem:[#allocation2 + $0x10] sm:$0xff] %vm935_vm2, %v2075_v60 }
 0x2fb   :  { %v2071_v16 = vsel %vm886_vm1, %v2067_v2, %v2043_v20 }
 0x2fe   :  { %v2059_v37 = vpop.permute.xlu1 %2058 }
 0x2ff   :  { %v2076_v56 = vsel %vm2072_vm3, %v2071_v16, %v2059_v37 }
 0x300   :  { %2080 = vst.msk [vmem:[#allocation2 + $0x18] sm:$0xff] %vm935_vm2, %v2076_v56 }
 0x301   :  { %2601 = shalt.err (!%p2598_p4)
}
 0x302   :  { %s2616_s16 = smov 128  }
 0x303   :  { %2092 = dma.vmem_to_hbm [thread:$0]  %s2087_s14, 512, %s3368_s5, [#allocation3], %s2616_s16, %s2616_s16, %s2612_s3  }
 0x304   :  { %2610 = dma.done.wait [#allocation3], 512  }
 0x305   :  { %2611 = vsyncadd [#allocation3], 4294966784 }
 0x306   :  { %2096 = vsyncpa [#allocation3], 1 }

</bundles_post_ra>
